<compile_context>
chip_gen: v5e
topology: v5e:2x2
jax: 0.10.0
libtpu: 0.0.40
codegen_flags: <defaults>
</compile_context>

<pallas_src>
import math

import jax
import jax.numpy as jnp
from jax import lax
from jax.experimental import pallas as pl
from jax.experimental.pallas import tpu as pltpu


def _round_up(x, m):
    return (x + m - 1) // m * m


# Packed rows processed per inner compute chunk (keeps the f32 hidden
# intermediate small regardless of how large the DMA row tile is).
_CHUNK_PACKED_ROWS = 256


def _link_pre_kernel(x_ref, w1_ref, b1_ref, w2_ref, b2_ref, o_ref):
    # x_ref:  (tmp, p*Lp_in)        VMEM (packed row tile)
    # w1_ref: (p*Lp_in, p*Lp_m_p)   VMEM (block-diagonal, resident)
    # b1_ref: (1, p*Lp_m_p)         VMEM
    # w2_ref: (p*Lp_m_p, p*Lp_out)  VMEM (block-diagonal, resident)
    # b2_ref: (1, p*Lp_out)         VMEM
    # o_ref:  (tmp, p*Lp_out)       VMEM
    rows = x_ref.shape[0]
    chunk = min(_CHUNK_PACKED_ROWS, rows)
    n_full = rows // chunk
    rem = rows - n_full * chunk
    out_dtype = o_ref.dtype

    def compute(r0, nr):
        x = x_ref[pl.ds(r0, nr), :]
        # Linear1 + (inference-mode) dropout + ReLU
        h = jnp.dot(x, w1_ref[...], preferred_element_type=jnp.float32) + b1_ref[...]
        h = jnp.maximum(h, 0.0)
        # Linear2 + sigmoid
        y = jnp.dot(h.astype(w2_ref.dtype), w2_ref[...],
                    preferred_element_type=jnp.float32) + b2_ref[...]
        o_ref[pl.ds(r0, nr), :] = jax.nn.sigmoid(y).astype(out_dtype)

    def body(c, carry):
        compute(pl.multiple_of(c * chunk, chunk), chunk)
        return carry

    lax.fori_loop(0, n_full, body, 0, unroll=False)
    if rem:                       # static tail (rows is a static block dim)
        compute(n_full * chunk, rem)


def _pack_factor(lp_in, lp_out):
    # Smallest p such that p*lp_in and p*lp_out are both multiples of 128.
    f_in = 128 // math.gcd(lp_in, 128)
    f_out = 128 // math.gcd(lp_out, 128)
    return f_in * f_out // math.gcd(f_in, f_out)


def link_pre_layer(x, w1, b1, w2, b2, *, tm=None):
    """adj_est = sigmoid(relu(x @ w1 + b1) @ w2 + b2)   (dropout = identity).

    x:  [N, Lp_in];  w1: [Lp_in, Lp_m];  b1: [Lp_m];  w2: [Lp_m, Lp_out];  b2: [Lp_out]
    """
    N, Lp_in = x.shape
    Lp_m = w1.shape[1]
    Lp_out = w2.shape[1]
    assert w1.shape[0] == Lp_in and w2.shape[0] == Lp_m
    assert b1.shape == (Lp_m,) and b2.shape == (Lp_out,)

    x_item = jnp.dtype(x.dtype).itemsize
    w_item = jnp.dtype(w1.dtype).itemsize

    # ---- lane-dense row packing (exact; block-diagonal weights) -------------
    p = _pack_factor(Lp_in, Lp_out)
    w_packed_bytes = p * p * (Lp_in * Lp_m + Lp_m * Lp_out) * w_item
    if p > 8 or w_packed_bytes > (8 << 20):
        p = 1                                  # fall back to unpacked layout

    # Pad hidden dim so the packed hidden width is a lane multiple.
    # Exact: relu(x@0 + 0) = 0 and the matching w2 rows are zero.
    Lp_m_p = _round_up(Lp_m, max(1, 128 // p))
    if Lp_m_p != Lp_m:
        pad = Lp_m_p - Lp_m
        w1 = jnp.pad(w1, ((0, 0), (0, pad)))
        b1 = jnp.pad(b1, ((0, pad),))
        w2 = jnp.pad(w2, ((0, pad), (0, 0)))

    if p > 1:
        w1_k = jnp.kron(jnp.eye(p, dtype=w1.dtype), w1)   # [p*Lp_in,  p*Lp_m_p]
        w2_k = jnp.kron(jnp.eye(p, dtype=w2.dtype), w2)   # [p*Lp_m_p, p*Lp_out]
        b1_k = jnp.tile(b1, p).reshape(1, p * Lp_m_p)
        b2_k = jnp.tile(b2, p).reshape(1, p * Lp_out)
    else:
        w1_k, w2_k = w1, w2
        b1_k = b1.reshape(1, Lp_m_p)
        b2_k = b2.reshape(1, Lp_out)

    in_w, mid_w, out_w = p * Lp_in, p * Lp_m_p, p * Lp_out

    # ---- row tiling (generation-aware) ---------------------------------------
    try:
        vmem_cap = int(pltpu.get_tpu_info().vmem_capacity_bytes)
    except Exception:
        vmem_cap = 64 << 20                   # conservative (v7x-sized) fallback

    row_multiple = 16 * p                     # packed rows stay sublane aligned
    if tm is None:
        budget = min(int(vmem_cap * 0.35), 32 << 20)   # tile budget for x/out
        per_row = 2 * (Lp_in + Lp_out) * x_item        # double-buffered in+out
        tm = budget // max(per_row, 1)
    tm_eff = max(row_multiple, min(int(tm), 32768))
    tm_eff = _round_up(tm_eff, row_multiple)
    n_min = _round_up(N, row_multiple)
    tm_eff = min(tm_eff, n_min)

    N_pad = _round_up(N, tm_eff)
    if N_pad != N:
        x = jnp.pad(x, ((0, N_pad - N), (0, 0)))
    x_pk = x.reshape(N_pad // p, in_w) if p > 1 else x   # contiguous reshape

    tmp = tm_eff // p                          # packed rows per grid step
    grid = (N_pad // tm_eff,)

    # VMEM budget: double-buffered x/out tiles + chunk-sized f32 intermediates
    # + resident weights, with 50% headroom; never more than 75% of physical.
    chunk = min(_CHUNK_PACKED_ROWS, tmp)
    est = (2 * tmp * in_w * x_item
           + 2 * tmp * out_w * x_item
           + chunk * mid_w * 4
           + chunk * out_w * 4
           + (in_w * mid_w + mid_w * out_w) * w_item
           + (mid_w + out_w) * 4)
    vmem_limit = min(int(vmem_cap * 0.75),
                     max(32 << 20, int(est * 1.5) + (2 << 20)))

    out_shape = jax.ShapeDtypeStruct((N_pad // p, out_w), x.dtype)

    def _call(single_buffer_weights):
        def wspec(shape):
            if single_buffer_weights:
                # Constant index_map -> block stays resident; one buffer suffices.
                return pl.BlockSpec(shape, lambda i: (0, 0),
                                    pipeline_mode=pl.Buffered(1))
            return pl.BlockSpec(shape, lambda i: (0, 0))

        return pl.pallas_call(
            _link_pre_kernel,
            out_shape=out_shape,
            grid_spec=pltpu.PrefetchScalarGridSpec(
                num_scalar_prefetch=0,
                grid=grid,
                in_specs=[
                    pl.BlockSpec((tmp, in_w), lambda i: (i, 0)),   # packed x rows
                    wspec((in_w, mid_w)),                          # W1 (block-diag)
                    wspec((1, mid_w)),                             # b1
                    wspec((mid_w, out_w)),                         # W2 (block-diag)
                    wspec((1, out_w)),                             # b2
                ],
                out_specs=pl.BlockSpec((tmp, out_w), lambda i: (i, 0)),
            ),
            compiler_params=pltpu.CompilerParams(
                dimension_semantics=("parallel",),  # row axis shards across TCs
                vmem_limit_bytes=int(vmem_limit)),
        )(x_pk, w1_k, b1_k, w2_k, b2_k)

    try:
        out = _call(True)        # single-buffered resident weights
    except Exception:
        out = _call(False)       # fallback if pl.Buffered(1) is not accepted

    if p > 1:
        out = out.reshape(N_pad, Lp_out)
    return out[:N] if N_pad != N else out


def _ref(x, w1, b1, w2, b2):
    h = jnp.maximum(x @ w1 + b1, 0.0)
    return jax.nn.sigmoid(h @ w2 + b2)


if __name__ == "__main__":
    # Small shapes consistent with the module: Lp_in=32, Lp_m=64, Lp_out=32, N=16 rows.
    Lp_in, Lp_m, Lp_out, N = 32, 64, 32, 16

    key = jax.random.PRNGKey(0)
    kx, k1, k2, k3, k4, kx2 = jax.random.split(key, 6)

    x = jax.random.normal(kx, (N, Lp_in), dtype=jnp.float32)

    # Deterministic parameter init (uniform, like torch Linear default scale).
    bound1 = 1.0 / (Lp_in ** 0.5)
    bound2 = 1.0 / (Lp_m ** 0.5)
    w1 = jax.random.uniform(k1, (Lp_in, Lp_m), minval=-bound1, maxval=bound1, dtype=jnp.float32)
    b1 = jax.random.uniform(k2, (Lp_m,), minval=-bound1, maxval=bound1, dtype=jnp.float32)
    w2 = jax.random.uniform(k3, (Lp_m, Lp_out), minval=-bound2, maxval=bound2, dtype=jnp.float32)
    b2 = jax.random.uniform(k4, (Lp_out,), minval=-bound2, maxval=bound2, dtype=jnp.float32)

    out = jax.block_until_ready(link_pre_layer(x, w1, b1, w2, b2))
    ref = _ref(x, w1, b1, w2, b2)
    assert out.shape == (N, Lp_out)
    assert jnp.allclose(out, ref, atol=2e-5, rtol=2e-5), "mismatch vs reference (packed path)"

    # Non-tile-multiple N exercises the wrapper-side row padding path.
    N2 = 300
    x2 = jax.random.normal(kx2, (N2, Lp_in), dtype=jnp.float32)
    out2 = jax.block_until_ready(link_pre_layer(x2, w1, b1, w2, b2))
    assert out2.shape == (N2, Lp_out)
    assert jnp.allclose(out2, _ref(x2, w1, b1, w2, b2), atol=2e-5, rtol=2e-5)

    # Already-lane-dense dims exercise the p=1 (unpacked) fallback path.
    Li3, Lm3, Lo3, N3 = 128, 48, 128, 24
    x3 = jax.random.normal(kx, (N3, Li3), dtype=jnp.float32)
    w13 = jax.random.uniform(k1, (Li3, Lm3), minval=-0.1, maxval=0.1, dtype=jnp.float32)
    b13 = jax.random.uniform(k2, (Lm3,), minval=-0.1, maxval=0.1, dtype=jnp.float32)
    w23 = jax.random.uniform(k3, (Lm3, Lo3), minval=-0.1, maxval=0.1, dtype=jnp.float32)
    b23 = jax.random.uniform(k4, (Lo3,), minval=-0.1, maxval=0.1, dtype=jnp.float32)
    out3 = jax.block_until_ready(link_pre_layer(x3, w13, b13, w23, b23))
    assert out3.shape == (N3, Lo3)
    assert jnp.allclose(out3, _ref(x3, w13, b13, w23, b23), atol=2e-5, rtol=2e-5)

    print("KERNEL_OK")
</pallas_src>

<mosaic_0001>
module attributes {stable_mosaic.version = 11 : i64} {
  func.func @_link_pre_kernel(%arg0: i32, %arg1: memref<16x128xf32, #tpu.memory_space<vmem>>, %arg2: memref<128x256xf32, #tpu.memory_space<vmem>>, %arg3: memref<1x256xf32, #tpu.memory_space<vmem>>, %arg4: memref<256x128xf32, #tpu.memory_space<vmem>>, %arg5: memref<1x128xf32, #tpu.memory_space<vmem>>, %arg6: memref<16x128xf32, #tpu.memory_space<vmem>>) attributes {dimension_semantics = [#tpu.dimension_semantics<parallel>], iteration_bounds = array<i64: 1>, scalar_prefetch = 0 : i64, scratch_operands = 0 : i64, tpu.core_type = #tpu.core_type<tc>, window_params = [{transform_indices = @transform_0, window_bounds = array<i64: 16, 128>}, {pipeline_mode = #tpu.pipeline_mode<synchronous>, transform_indices = @transform_1, window_bounds = array<i64: 128, 256>}, {pipeline_mode = #tpu.pipeline_mode<synchronous>, transform_indices = @transform_2, window_bounds = array<i64: 1, 256>}, {pipeline_mode = #tpu.pipeline_mode<synchronous>, transform_indices = @transform_3, window_bounds = array<i64: 256, 128>}, {pipeline_mode = #tpu.pipeline_mode<synchronous>, transform_indices = @transform_4, window_bounds = array<i64: 1, 128>}, {transform_indices = @transform_5, window_bounds = array<i64: 16, 128>}]} {
    %c0_i32 = arith.constant 0 : i32
    %c16_i32 = arith.constant 16 : i32
    %0 = arith.muli %c0_i32, %c16_i32 : i32
    %1 = tpu.assume_multiple %0, 16 : i32
    %2 = arith.index_cast %1 : i32 to index
    %c0 = arith.constant 0 : index
    %3 = vector.load %arg1[%2, %c0] : memref<16x128xf32, #tpu.memory_space<vmem>>, vector<16x128xf32>
    %c0_0 = arith.constant 0 : index
    %c0_1 = arith.constant 0 : index
    %4 = vector.load %arg2[%c0_0, %c0_1] : memref<128x256xf32, #tpu.memory_space<vmem>>, vector<128x256xf32>
    %cst = arith.constant dense<0.000000e+00> : vector<16x256xf32>
    %5 = tpu.matmul %3, %4, %cst {dimension_numbers = #tpu.dot_dimension_numbers<[1], [0], [0], [1], [0, 0, 1, 1], [], []>} : vector<16x128xf32>, vector<128x256xf32>, vector<16x256xf32> -> vector<16x256xf32>
    %c0_2 = arith.constant 0 : index
    %c0_3 = arith.constant 0 : index
    %6 = vector.load %arg3[%c0_2, %c0_3] : memref<1x256xf32, #tpu.memory_space<vmem>>, vector<1x256xf32>
    %7 = vector.broadcast %6 : vector<1x256xf32> to vector<16x256xf32>
    %8 = arith.addf %5, %7 : vector<16x256xf32>
    %cst_4 = arith.constant 0.000000e+00 : f32
    %9 = vector.broadcast %cst_4 : f32 to vector<16x256xf32>
    %10 = arith.maximumf %8, %9 : vector<16x256xf32>
    %c0_5 = arith.constant 0 : index
    %c0_6 = arith.constant 0 : index
    %11 = vector.load %arg4[%c0_5, %c0_6] : memref<256x128xf32, #tpu.memory_space<vmem>>, vector<256x128xf32>
    %cst_7 = arith.constant dense<0.000000e+00> : vector<16x128xf32>
    %12 = tpu.matmul %10, %11, %cst_7 {dimension_numbers = #tpu.dot_dimension_numbers<[1], [0], [0], [1], [0, 0, 1, 1], [], []>} : vector<16x256xf32>, vector<256x128xf32>, vector<16x128xf32> -> vector<16x128xf32>
    %c0_8 = arith.constant 0 : index
    %c0_9 = arith.constant 0 : index
    %13 = vector.load %arg5[%c0_8, %c0_9] : memref<1x128xf32, #tpu.memory_space<vmem>>, vector<1x128xf32>
    %14 = vector.broadcast %13 : vector<1x128xf32> to vector<16x128xf32>
    %15 = arith.addf %12, %14 : vector<16x128xf32>
    %16 = arith.negf %15 : vector<16x128xf32>
    %17 = math.exp %16 : vector<16x128xf32>
    %cst_10 = arith.constant 1.000000e+00 : f32
    %18 = vector.broadcast %cst_10 : f32 to vector<16x128xf32>
    %19 = arith.addf %18, %17 : vector<16x128xf32>
    %20 = arith.divf %18, %19 : vector<16x128xf32>
    %21 = arith.index_cast %1 : i32 to index
    %c0_11 = arith.constant 0 : index
    %22 = vector.load %arg6[%21, %c0_11] : memref<16x128xf32, #tpu.memory_space<vmem>>, vector<16x128xf32>
    tpu.vector_store %arg6[%21, %c0_11], %20 {strides = array<i32>} : memref<16x128xf32, #tpu.memory_space<vmem>>, vector<16x128xf32>,
    %c1_i32 = arith.constant 1 : i32
    return
  }
  func.func @transform_0(%arg0: i32) -> (i32, i32) {
    %c0_i32 = arith.constant 0 : i32
    %c0_i32_0 = arith.constant 0 : i32
    return %arg0, %c0_i32 : i32, i32
  }
  func.func @transform_1(%arg0: i32) -> (i32, i32) {
    %c0_i32 = arith.constant 0 : i32
    %c0_i32_0 = arith.constant 0 : i32
    %c0_i32_1 = arith.constant 0 : i32
    return %c0_i32, %c0_i32_0 : i32, i32
  }
  func.func @transform_2(%arg0: i32) -> (i32, i32) {
    %c0_i32 = arith.constant 0 : i32
    %c0_i32_0 = arith.constant 0 : i32
    %c0_i32_1 = arith.constant 0 : i32
    return %c0_i32, %c0_i32_0 : i32, i32
  }
  func.func @transform_3(%arg0: i32) -> (i32, i32) {
    %c0_i32 = arith.constant 0 : i32
    %c0_i32_0 = arith.constant 0 : i32
    %c0_i32_1 = arith.constant 0 : i32
    return %c0_i32, %c0_i32_0 : i32, i32
  }
  func.func @transform_4(%arg0: i32) -> (i32, i32) {
    %c0_i32 = arith.constant 0 : i32
    %c0_i32_0 = arith.constant 0 : i32
    %c0_i32_1 = arith.constant 0 : i32
    return %c0_i32, %c0_i32_0 : i32, i32
  }
  func.func @transform_5(%arg0: i32) -> (i32, i32) {
    %c0_i32 = arith.constant 0 : i32
    %c0_i32_0 = arith.constant 0 : i32
    return %arg0, %c0_i32 : i32, i32
  }
}

module attributes {stable_mosaic.version = 11 : i64} {
  func.func @_link_pre_kernel(%arg0: i32, %arg1: memref<16x128xf32, #tpu.memory_space<vmem>>, %arg2: memref<128x256xf32, #tpu.memory_space<vmem>>, %arg3: memref<1x256xf32, #tpu.memory_space<vmem>>, %arg4: memref<256x128xf32, #tpu.memory_space<vmem>>, %arg5: memref<1x128xf32, #tpu.memory_space<vmem>>, %arg6: memref<16x128xf32, #tpu.memory_space<vmem>>) attributes {dimension_semantics = [#tpu.dimension_semantics<parallel>], iteration_bounds = array<i64: 1>, scalar_prefetch = 0 : i64, scratch_operands = 0 : i64, tpu.core_type = #tpu.core_type<tc>, window_params = [{transform_indices = @transform_0, window_bounds = array<i64: 16, 128>}, {pipeline_mode = #tpu.pipeline_mode<synchronous>, transform_indices = @transform_1, window_bounds = array<i64: 128, 256>}, {pipeline_mode = #tpu.pipeline_mode<synchronous>, transform_indices = @transform_2, window_bounds = array<i64: 1, 256>}, {pipeline_mode = #tpu.pipeline_mode<synchronous>, transform_indices = @transform_3, window_bounds = array<i64: 256, 128>}, {pipeline_mode = #tpu.pipeline_mode<synchronous>, transform_indices = @transform_4, window_bounds = array<i64: 1, 128>}, {transform_indices = @transform_5, window_bounds = array<i64: 16, 128>}]} {
    %c0_i32 = arith.constant 0 : i32
    %c16_i32 = arith.constant 16 : i32
    %0 = arith.muli %c0_i32, %c16_i32 : i32
    %1 = tpu.assume_multiple %0, 16 : i32
    %2 = arith.index_cast %1 : i32 to index
    %c0 = arith.constant 0 : index
    %3 = vector.load %arg1[%2, %c0] : memref<16x128xf32, #tpu.memory_space<vmem>>, vector<16x128xf32>
    %c0_0 = arith.constant 0 : index
    %c0_1 = arith.constant 0 : index
    %4 = vector.load %arg2[%c0_0, %c0_1] : memref<128x256xf32, #tpu.memory_space<vmem>>, vector<128x256xf32>
    %cst = arith.constant dense<0.000000e+00> : vector<16x256xf32>
    %5 = tpu.matmul %3, %4, %cst {dimension_numbers = #tpu.dot_dimension_numbers<[1], [0], [0], [1], [0, 0, 1, 1], [], []>} : vector<16x128xf32>, vector<128x256xf32>, vector<16x256xf32> -> vector<16x256xf32>
    %c0_2 = arith.constant 0 : index
    %c0_3 = arith.constant 0 : index
    %6 = vector.load %arg3[%c0_2, %c0_3] : memref<1x256xf32, #tpu.memory_space<vmem>>, vector<1x256xf32>
    %7 = vector.broadcast %6 : vector<1x256xf32> to vector<16x256xf32>
    %8 = arith.addf %5, %7 : vector<16x256xf32>
    %cst_4 = arith.constant 0.000000e+00 : f32
    %9 = vector.broadcast %cst_4 : f32 to vector<16x256xf32>
    %10 = arith.maximumf %8, %9 : vector<16x256xf32>
    %c0_5 = arith.constant 0 : index
    %c0_6 = arith.constant 0 : index
    %11 = vector.load %arg4[%c0_5, %c0_6] : memref<256x128xf32, #tpu.memory_space<vmem>>, vector<256x128xf32>
    %cst_7 = arith.constant dense<0.000000e+00> : vector<16x128xf32>
    %12 = tpu.matmul %10, %11, %cst_7 {dimension_numbers = #tpu.dot_dimension_numbers<[1], [0], [0], [1], [0, 0, 1, 1], [], []>} : vector<16x256xf32>, vector<256x128xf32>, vector<16x128xf32> -> vector<16x128xf32>
    %c0_8 = arith.constant 0 : index
    %c0_9 = arith.constant 0 : index
    %13 = vector.load %arg5[%c0_8, %c0_9] : memref<1x128xf32, #tpu.memory_space<vmem>>, vector<1x128xf32>
    %14 = vector.broadcast %13 : vector<1x128xf32> to vector<16x128xf32>
    %15 = arith.addf %12, %14 : vector<16x128xf32>
    %16 = arith.negf %15 : vector<16x128xf32>
    %17 = math.exp %16 : vector<16x128xf32>
    %cst_10 = arith.constant 1.000000e+00 : f32
    %18 = vector.broadcast %cst_10 : f32 to vector<16x128xf32>
    %19 = arith.addf %18, %17 : vector<16x128xf32>
    %20 = arith.divf %18, %19 : vector<16x128xf32>
    %21 = arith.index_cast %1 : i32 to index
    %c0_11 = arith.constant 0 : index
    %22 = vector.load %arg6[%21, %c0_11] : memref<16x128xf32, #tpu.memory_space<vmem>>, vector<16x128xf32>
    tpu.vector_store %arg6[%21, %c0_11], %20 {strides = array<i32>} : memref<16x128xf32, #tpu.memory_space<vmem>>, vector<16x128xf32>,
    %c1_i32 = arith.constant 1 : i32
    return
  }
  func.func @transform_0(%arg0: i32) -> (i32, i32) {
    %c0_i32 = arith.constant 0 : i32
    %c0_i32_0 = arith.constant 0 : i32
    return %arg0, %c0_i32 : i32, i32
  }
  func.func @transform_1(%arg0: i32) -> (i32, i32) {
    %c0_i32 = arith.constant 0 : i32
    %c0_i32_0 = arith.constant 0 : i32
    %c0_i32_1 = arith.constant 0 : i32
    return %c0_i32, %c0_i32_0 : i32, i32
  }
  func.func @transform_2(%arg0: i32) -> (i32, i32) {
    %c0_i32 = arith.constant 0 : i32
    %c0_i32_0 = arith.constant 0 : i32
    %c0_i32_1 = arith.constant 0 : i32
    return %c0_i32, %c0_i32_0 : i32, i32
  }
  func.func @transform_3(%arg0: i32) -> (i32, i32) {
    %c0_i32 = arith.constant 0 : i32
    %c0_i32_0 = arith.constant 0 : i32
    %c0_i32_1 = arith.constant 0 : i32
    return %c0_i32, %c0_i32_0 : i32, i32
  }
  func.func @transform_4(%arg0: i32) -> (i32, i32) {
    %c0_i32 = arith.constant 0 : i32
    %c0_i32_0 = arith.constant 0 : i32
    %c0_i32_1 = arith.constant 0 : i32
    return %c0_i32, %c0_i32_0 : i32, i32
  }
  func.func @transform_5(%arg0: i32) -> (i32, i32) {
    %c0_i32 = arith.constant 0 : i32
    %c0_i32_0 = arith.constant 0 : i32
    return %arg0, %c0_i32 : i32, i32
  }
}

</mosaic_0001>

<bundles_post_ra>
// kernel: tpu_custom_call.1
= control target key start
LH: loop header
LB: loop body
LE: loop exit
PB: predicated region body
PF: predicated region fallthrough
CT: control target
= control target key end

     0   :  { %10 = vsyncpa [#allocation3], 0  ;;  %s529_s0 = inlined_call_operand.hbm [shape: f32[16,128], index: 0, kind: input, shape index: {}]   ;;  %s530_s1 = inlined_call_operand.hbm [shape: f32[128,256], index: 1, kind: input, shape index: {}]   ;;  %s531_s2 = inlined_call_operand.hbm [shape: f32[1,256], index: 2, kind: input, shape index: {}]   ;;  %s532_s3 = inlined_call_operand.hbm [shape: f32[256,128], index: 3, kind: input, shape index: {}]   ;;  %s533_s4 = inlined_call_operand.vmem [shape: f32[1,128], index: 4, kind: input, shape index: {}]   ;;  %s534_s5 = inlined_call_operand.hbm [shape: f32[16,128], index: 5, kind: output, shape index: {}]  }
   0x1   :  { %11 = vsyncpa [#allocation6], 0 }
   0x2   :  { %12 = vsyncpa [#allocation9], 0  ;;  %s31_s20 = sshll.u32 %s530_s1, 4  ;;  %s32_s20 = int_to_ptr.hbm [resolvable:$true] %s31_s20 }
   0x3   :  { %13 = vsyncpa [#allocation4], 0  ;;  %s463_s21 = smov [#allocation5]   ;;  %s18_s25 = sshll.u32 %s529_s0, 4  ;;  %s19_s25 = int_to_ptr.hbm [resolvable:$true] %s18_s25 }
   0x4   :  { %s33_s22 = sshll.u32 %s463_s21, 4  ;;  %s464_s26 = smov 256   ;;  %s34_s22 = int_to_ptr.vmem [resolvable:$true] %s33_s22 }
   0x5   :  { %s465_s27 = smov 16   ;;  %s466_s28 = smov [#allocation2]  }
   0x6   :  { %39 = dma.hbm_to_vmem [thread:$0]  %s32_s20, 4096, %s34_s22, [#allocation6], %s464_s26, %s464_s26, %s465_s27  }
   0x7   :  { %s20_s29 = sshll.u32 %s466_s28, 4  ;;  %s467_s30 = smov 128   ;;  %s21_s29 = int_to_ptr.vmem [resolvable:$true] %s20_s29 }
   0x8   :  { %s468_s6 = smov 8   ;;  %s45_s8 = sshll.u32 %s531_s2, 4  ;;  %s46_s8 = int_to_ptr.hbm [resolvable:$true] %s45_s8 }
   0x9   :  { %26 = dma.hbm_to_vmem [thread:$0]  %s19_s25, 256, %s21_s29, [#allocation3], %s467_s30, %s467_s30, %s468_s6  }
   0xa   :  { %s469_s9 = smov [#allocation7]   ;;  %s55_s12 = sshll.u32 %s532_s3, 4  ;;  %s56_s12 = int_to_ptr.hbm [resolvable:$true] %s55_s12 }
   0xb   :  { %s47_s0 = sshll.u32 %s469_s9, 4  ;;  %s470_s13 = smov [#allocation8]   ;;  %s48_s0 = int_to_ptr.vmem [resolvable:$true] %s47_s0 }
   0xc   :  { %50 = dma.hbm_to_vmem [thread:$0]  %s46_s8, 32, %s48_s0, [#allocation6]  }
   0xd   :  { %s57_s14 = sshll.u32 %s470_s13, 4  ;;  %s58_s14 = int_to_ptr.vmem [resolvable:$true] %s57_s14 }
   0xe   :  { %63 = dma.hbm_to_vmem [thread:$0]  %s56_s12, 4096, %s58_s14, [#allocation9], %s467_s30, %s467_s30, %s468_s6  }
   0xf   :  { %455 = dma.done.wait [#allocation3], 256  }
  0x10   :  { %456 = vsyncadd [#allocation3], 4294967040 }
  0x11   :  { %457 = dma.done.wait [#allocation6], 4128  }
  0x12   :  { %458 = vsyncadd [#allocation6], 4294963168 }
  0x13   :  { %459 = dma.done.wait [#allocation9], 4096  }
  0x14   :  { %460 = vsyncadd [#allocation9], 4294963200  ;;  %v114_v0 = vld [vmem:[#allocation5 + $0xf0] sm:$0xff]  ;;  %v112_v1 = vld [vmem:[#allocation5 + $0xe0] sm:$0xff]  ;;  %s300_s18 = sshll.u32 %s534_s5, 4  ;;  %s301_s18 = int_to_ptr.hbm [resolvable:$true] %s300_s18 }
  0x15   :  { %v115_v2 = vld [vmem:[#allocation5 + $0xf8] sm:$0xff]  ;;  %122 = vmatpush.msra.mxu0 %v114_v0  ;;  %v113_v3 = vld [vmem:[#allocation5 + $0xe8] sm:$0xff]  ;;  %v110_v4 = vld [vmem:[#allocation5 + $0xd0] sm:$0xff] }
  0x16   :  { %145 = vmatpush.msra.mxu1 %v115_v2  ;;  %v111_v5 = vld [vmem:[#allocation5 + $0xd8] sm:$0xff]  ;;  %v108_v6 = vld [vmem:[#allocation5 + $0xc0] sm:$0xff]  ;;  %v109_v7 = vld [vmem:[#allocation5 + $0xc8] sm:$0xff] }
  0x17   :  { %123 = vmatpush.msra.mxu0 %v112_v1  ;;  %v106_v8 = vld [vmem:[#allocation5 + $0xb0] sm:$0xff]  ;;  %v107_v9 = vld [vmem:[#allocation5 + $0xb8] sm:$0xff]  ;;  %v104_v10 = vld [vmem:[#allocation5 + $0xa0] sm:$0xff] }
  0x18   :  { %146 = vmatpush.msra.mxu1 %v113_v3  ;;  %v105_v11 = vld [vmem:[#allocation5 + $0xa8] sm:$0xff]  ;;  %v102_v12 = vld [vmem:[#allocation5 + $0x90] sm:$0xff]  ;;  %v103_v13 = vld [vmem:[#allocation5 + $0x98] sm:$0xff] }
  0x19   :  { %124 = vmatpush.msra.mxu0 %v110_v4  ;;  %v187_v14 = vld [vmem:[#allocation8 + $0x78] sm:$0xff]  ;;  %v186_v15 = vld [vmem:[#allocation8 + $0x70] sm:$0xff]  ;;  %v101_v17 = vld [vmem:[#allocation5 + $0x88] sm:$0xff] }
  0x1a   :  { %147 = vmatpush.msra.mxu1 %v111_v5  ;;  %v100_v16 = vld [vmem:[#allocation5 + $0x80] sm:$0xff]  ;;  %208 = vmatpush.msra.mxu2 %v187_v14  ;;  %v185_v19 = vld [vmem:[#allocation8 + $0x68] sm:$0xff]  ;;  %v202_v20 = vld [vmem:[#allocation8 + $0xf0] sm:$0xff] }
  0x1b   :  { %125 = vmatpush.msra.mxu0 %v108_v6  ;;  %v203_v18 = vld [vmem:[#allocation8 + $0xf8] sm:$0xff]  ;;  %v98_v21 = vld [vmem:[#allocation5 + $0x70] sm:$0xff]  ;;  %v184_v23 = vld [vmem:[#allocation8 + $0x60] sm:$0xff] }
  0x1c   :  { %148 = vmatpush.msra.mxu1 %v109_v7  ;;  %v99_v22 = vld [vmem:[#allocation5 + $0x78] sm:$0xff]  ;;  %209 = vmatpush.msra.mxu2 %v186_v15  ;;  %v201_v24 = vld [vmem:[#allocation8 + $0xe8] sm:$0xff]  ;;  %v96_v25 = vld [vmem:[#allocation5 + $0x60] sm:$0xff] }
  0x1d   :  { %126 = vmatpush.msra.mxu0 %v106_v8  ;;  %231 = vmatpush.msra.mxu3 %v203_v18  ;;  %v97_v26 = vld [vmem:[#allocation5 + $0x68] sm:$0xff]  ;;  %v183_v27 = vld [vmem:[#allocation8 + $0x58] sm:$0xff]  ;;  %v94_v29 = vld [vmem:[#allocation5 + $0x50] sm:$0xff] }
  0x1e   :  { %149 = vmatpush.msra.mxu1 %v107_v9  ;;  %210 = vmatpush.msra.mxu2 %v185_v19  ;;  %v200_v28 = vld [vmem:[#allocation8 + $0xe0] sm:$0xff]  ;;  %v95_v30 = vld [vmem:[#allocation5 + $0x58] sm:$0xff]  ;;  %v181_v35 = vld [vmem:[#allocation8 + $0x48] sm:$0xff] }
  0x1f   :  { %127 = vmatpush.msra.mxu0 %v104_v10  ;;  %232 = vmatpush.msra.mxu3 %v202_v20  ;;  %v182_v31 = vld [vmem:[#allocation8 + $0x50] sm:$0xff]  ;;  %v199_v32 = vld [vmem:[#allocation8 + $0xd8] sm:$0xff]  ;;  %v93_v34 = vld [vmem:[#allocation5 + $0x48] sm:$0xff] }
  0x20   :  { %150 = vmatpush.msra.mxu1 %v105_v11  ;;  %211 = vmatpush.msra.mxu2 %v184_v23  ;;  %v92_v33 = vld [vmem:[#allocation5 + $0x40] sm:$0xff]  ;;  %v198_v36 = vld [vmem:[#allocation8 + $0xd0] sm:$0xff]  ;;  %v197_v40 = vld [vmem:[#allocation8 + $0xc8] sm:$0xff] }
  0x21   :  { %128 = vmatpush.msra.mxu0 %v102_v12  ;;  %233 = vmatpush.msra.mxu3 %v201_v24  ;;  %v90_v37 = vld [vmem:[#allocation5 + $0x30] sm:$0xff]  ;;  %v91_v38 = vld [vmem:[#allocation5 + $0x38] sm:$0xff]  ;;  %v180_v39 = vld [vmem:[#allocation8 + $0x40] sm:$0xff] }
  0x22   :  { %151 = vmatpush.msra.mxu1 %v103_v13  ;;  %212 = vmatpush.msra.mxu2 %v183_v27  ;;  %v88_v41 = vld [vmem:[#allocation5 + $0x20] sm:$0xff]  ;;  %v89_v42 = vld [vmem:[#allocation5 + $0x28] sm:$0xff]  ;;  %v86_v45 = vld [vmem:[#allocation5 + $0x10] sm:$0xff] }
  0x23   :  { %129 = vmatpush.msra.mxu0 %v100_v16  ;;  %234 = vmatpush.msra.mxu3 %v200_v28  ;;  %v179_v43 = vld [vmem:[#allocation8 + $0x38] sm:$0xff]  ;;  %v196_v44 = vld [vmem:[#allocation8 + $0xc0] sm:$0xff]  ;;  %v178_v47 = vld [vmem:[#allocation8 + $0x30] sm:$0xff] }
  0x24   :  { %152 = vmatpush.msra.mxu1 %v101_v17  ;;  %213 = vmatpush.msra.mxu2 %v182_v31  ;;  %v87_v46 = vld [vmem:[#allocation5 + $0x18] sm:$0xff]  ;;  %v84_v49 = vld [vmem:[#allocation5] sm:$0xff]  ;;  %v85_v50 = vld [vmem:[#allocation5 + $0x8] sm:$0xff] }
  0x25   :  { %130 = vmatpush.msra.mxu0 %v98_v21  ;;  %235 = vmatpush.msra.mxu3 %v199_v32  ;;  %v195_v48 = vld [vmem:[#allocation8 + $0xb8] sm:$0xff]  ;;  %v82_v51 = vld [vmem:[#allocation2] sm:$0xff]  ;;  %v176_v54 = vld [vmem:[#allocation8 + $0x20] sm:$0xff] }
  0x26   :  { %153 = vmatpush.msra.mxu1 %v99_v22  ;;  %214 = vmatpush.msra.mxu2 %v181_v35  ;;  %v177_v52 = vld [vmem:[#allocation8 + $0x28] sm:$0xff]  ;;  %v194_v53 = vld [vmem:[#allocation8 + $0xb0] sm:$0xff]  ;;  %v175_v56 = vld [vmem:[#allocation8 + $0x18] sm:$0xff] }
  0x27   :  { %131 = vmatpush.msra.mxu0 %v96_v25  ;;  %236 = vmatpush.msra.mxu3 %v198_v36  ;;  %v193_v55 = vld [vmem:[#allocation8 + $0xa8] sm:$0xff]  ;;  %v192_v57 = vld [vmem:[#allocation8 + $0xa0] sm:$0xff]  ;;  %v83_v58 = vld [vmem:[#allocation2 + $0x8] sm:$0xff] }
  0x28   :  { %154 = vmatpush.msra.mxu1 %v97_v26  ;;  %215 = vmatpush.msra.mxu2 %v180_v39  ;;  %v174_v59 = vld [vmem:[#allocation8 + $0x10] sm:$0xff]  ;;  %v191_v60 = vld [vmem:[#allocation8 + $0x98] sm:$0xff]  ;;  %v173_v61 = vld [vmem:[#allocation8 + $0x8] sm:$0xff] }
  0x29   :  { %132 = vmatpush.msra.mxu0 %v94_v29  ;;  %237 = vmatpush.msra.mxu3 %v197_v40  ;;  %v190_v62 = vld [vmem:[#allocation8 + $0x90] sm:$0xff]  ;;  %v172_v63 = vld [vmem:[#allocation8] sm:$0xff]  ;;  %v189_v0 = vld [vmem:[#allocation8 + $0x88] sm:$0xff] }
  0x2a   :  { %155 = vmatpush.msra.mxu1 %v95_v30  ;;  %216 = vmatpush.msra.mxu2 %v179_v43  ;;  %v188_v1 = vld [vmem:[#allocation8 + $0x80] sm:$0xff]  ;;  %v116_v2 = vld [vmem:[#allocation7] sm:$0x3]  ;;  %v326_v17 = vld [vmem:[%s533_s4] ss:$0 sm:$0xff]  ;;  %s471_s4 = smov [#allocation10]  }
  0x2b   :  { %133 = vmatpush.msra.mxu0 %v92_v33  ;;  %238 = vmatpush.msra.mxu3 %v196_v44  ;;  %v118_v3 = vperm.slane %v116_v2, 0  ;;  %v119_v4 = vperm.slane %v116_v2, 1  ;;  %s298_s15 = sshll.u32 %s471_s4, 4  ;;  %s299_s15 = int_to_ptr.vmem [resolvable:$true] %s298_s15 }
  0x2c   :  { %156 = vmatpush.msra.mxu1 %v93_v34  ;;  %217 = vmatpush.msra.mxu2 %v178_v47 }
  0x2d   :  { %134 = vmatpush.msra.mxu0 %v90_v37  ;;  %239 = vmatpush.msra.mxu3 %v195_v48 }
  0x2e   :  { %157 = vmatpush.msra.mxu1 %v91_v38  ;;  %218 = vmatpush.msra.mxu2 %v177_v52 }
  0x2f   :  { %135 = vmatpush.msra.mxu0 %v88_v41  ;;  %240 = vmatpush.msra.mxu3 %v194_v53 }
  0x30   :  { %158 = vmatpush.msra.mxu1 %v89_v42  ;;  %219 = vmatpush.msra.mxu2 %v176_v54 }
  0x31   :  { %136 = vmatpush.msra.mxu0 %v86_v45  ;;  %241 = vmatpush.msra.mxu3 %v193_v55 }
  0x32   :  { %159 = vmatpush.msra.mxu1 %v87_v46  ;;  %220 = vmatpush.msra.mxu2 %v175_v56 }
  0x33   :  { %137 = vmatpush.msra.mxu0 %v84_v49  ;;  %242 = vmatpush.msra.mxu3 %v192_v57 }
  0x34   :  { %160 = vmatpush.msra.mxu1 %v85_v50  ;;  %138 = vmatmul.f32.vlgmr.msra.gmra.mxu0 %v82_v51 }
  0x35   :  { %161 = vmatmul.f32.vlgmr.msra.gmra.mxu1 %v82_v51  ;;  %221 = vmatpush.msra.mxu2 %v174_v59 }
  0x36   :  { %243 = vmatpush.msra.mxu3 %v191_v60 }
  0x37   :  { %222 = vmatpush.msra.mxu2 %v173_v61 }
  0x38   :  { %244 = vmatpush.msra.mxu3 %v190_v62 }
  0x39   :  { %223 = vmatpush.msra.mxu2 %v172_v63 }
  0x3a   :  { %245 = vmatpush.msra.mxu3 %v189_v0 }
  0x3c   :  { %141 = vmatmul.f32.gmra.mxu0 %v83_v58  ;;  %246 = vmatpush.msra.mxu3 %v188_v1 }
  0x3d   :  { %164 = vmatmul.f32.gmra.mxu1 %v83_v58 }
  0xb1   :  { %v139_v5 = vpop.f32.mrf.mxu0 }
  0xb2   :  { %v162_v6 = vpop.f32.mrf.mxu1  ;;  %v140_v7 = vadd.f32 %v139_v5, %v118_v3 }
  0xb3   :  { %v163_v8 = vadd.f32 %v162_v6, %v119_v4 }
  0xb4   :  { %v168_v9 = vmax.f32 %v140_v7, 0.0 }
  0xb5   :  { %v169_v10 = vmax.f32 %v163_v8, 0.0 }
  0xb6   :  { %224 = vmatmul.f32.vlgmr.msra.gmra.mxu2 %v168_v9 }
  0xb7   :  { %247 = vmatmul.f32.vlgmr.msra.gmra.mxu3 %v169_v10 }
  0xb9   :  { %v142_v11 = vpop.f32.mrf.mxu0 }
  0xba   :  { %v165_v12 = vpop.f32.mrf.mxu1  ;;  %v143_v13 = vadd.f32 %v142_v11, %v118_v3 }
  0xbb   :  { %v166_v14 = vadd.f32 %v165_v12, %v119_v4 }
  0xbc   :  { %v170_v15 = vmax.f32 %v143_v13, 0.0 }
  0xbd   :  { %v171_v16 = vmax.f32 %v166_v14, 0.0 }
  0xbe   :  { %227 = vmatmul.f32.gmra.mxu2 %v170_v15 }
  0xbf   :  { %250 = vmatmul.f32.gmra.mxu3 %v171_v16 }
 0x139   :  { %v225_v18 = vpop.f32.mrf.mxu2 }
 0x13a   :  { %v248_v19 = vpop.f32.mrf.mxu3  ;;  %v226_v20 = vadd.f32 %v326_v17, %v225_v18 }
 0x13c   :  { %v249_v21 = vadd.f32 %v248_v19, %v226_v20 }
 0x13e   :  { %v315_v22 = vmul.f32 -1.442695, %v249_v21 }
 0x140   :  { %327 = vpow2.f32 %v315_v22 }
 0x141   :  { %v228_v23 = vpop.f32.mrf.mxu2 }
 0x142   :  { %v251_v24 = vpop.f32.mrf.mxu3  ;;  %v229_v25 = vadd.f32 %v326_v17, %v228_v23 }
 0x144   :  { %v252_v26 = vadd.f32 %v251_v24, %v229_v25 }
 0x146   :  { %v328_v27 = vpop.eup %327  ;;  %v316_v28 = vmul.f32 -1.442695, %v252_v26 }
 0x147   :  { %v260_v29 = vadd.f32 1.0, %v328_v27 }
 0x148   :  { %329 = vpow2.f32 %v316_v28 }
 0x149   :  { %331 = vrcp.f32 %v260_v29  ;;  %v273_v35 = vand.u32 2147483648, %v260_v29  ;;  %v271_v37 = vand.u32 2147483647, %v260_v29  ;;  %vm267_vm1 = vweird.f32 %v260_v29 }
 0x14b   :  { %v274_v40 = vor.u32 1.1754944e-38, %v273_v35  ;;  %vm272_vm3 = vcmp.eq.f32.partialorder %v271_v37, 8.507059e+37 }
 0x14e   :  { %v330_v30 = vpop.eup %329 }
 0x14f   :  { %v332_v31 = vpop.eup %331  ;;  %v261_v32 = vadd.f32 1.0, %v330_v30 }
 0x150   :  { %v263_v33 = vmul.f32 %v332_v31, %v260_v29  ;;  %vm268_vm0 = vweird.f32 %v332_v31 }
 0x151   :  { %333 = vrcp.f32 %v261_v32  ;;  %vm269_vm2 = vmor %vm267_vm1, %vm268_vm0  ;;  %v288_v45 = vand.u32 2147483648, %v261_v32  ;;  %v286_v47 = vand.u32 2147483647, %v261_v32  ;;  %vm282_vm5 = vweird.f32 %v261_v32 }
 0x152   :  { %v264_v34 = vsub.f32 1.0, %v263_v33 }
 0x153   :  { %v289_v49 = vor.u32 1.1754944e-38, %v288_v45  ;;  %vm287_vm7 = vcmp.eq.f32.partialorder %v286_v47, 8.507059e+37 }
 0x154   :  { %v265_v36 = vmul.f32 %v332_v31, %v264_v34 }
 0x156   :  { %v266_v38 = vadd.f32 %v332_v31, %v265_v36 }
 0x157   :  { %v334_v39 = vpop.eup %333 }
 0x158   :  { %v278_v41 = vmul.f32 %v334_v39, %v261_v32  ;;  %v270_v42 = vsel %vm269_vm2, %v332_v31, %v266_v38  ;;  %vm283_vm4 = vweird.f32 %v334_v39 }
 0x159   :  { %v275_v43 = vsel %vm272_vm3, %v274_v40, %v270_v42  ;;  %vm284_vm6 = vmor %vm282_vm5, %vm283_vm4 }
 0x15a   :  { %v279_v44 = vsub.f32 1.0, %v278_v41  ;;  %292 = vst [vmem:[#allocation10] sm:$0xff] %v275_v43 }
 0x15c   :  { %v280_v46 = vmul.f32 %v334_v39, %v279_v44 }
 0x15e   :  { %v281_v48 = vadd.f32 %v334_v39, %v280_v46 }
 0x160   :  { %v285_v50 = vsel %vm284_vm6, %v334_v39, %v281_v48 }
 0x161   :  { %v290_v51 = vsel %vm287_vm7, %v289_v49, %v285_v50 }
 0x162   :  { %293 = vst [vmem:[#allocation10 + $0x8] sm:$0xff] %v290_v51 }
 0x163   :  { %306 = dma.vmem_to_hbm [thread:$0]  %s299_s15, 256, %s301_s18, [#allocation4], %s467_s30, %s467_s30, %s468_s6  }
 0x164   :  { %461 = dma.done.wait [#allocation4], 256  }
 0x165   :  { %462 = vsyncadd [#allocation4], 4294967040 }
 0x166   :  { %311 = vsyncpa [#allocation3], 1 }
 0x167   :  { %312 = vsyncpa [#allocation6], 1 }
 0x168   :  { %313 = vsyncpa [#allocation9], 1 }
 0x169   :  { %314 = vsyncpa [#allocation4], 1 }

// kernel: tpu_custom_call.1
= control target key start
LH: loop header
LB: loop body
LE: loop exit
PB: predicated region body
PF: predicated region fallthrough
CT: control target
= control target key end

     0   :  { %10 = vsyncpa [#allocation3], 0  ;;  %s529_s0 = inlined_call_operand.hbm [shape: f32[16,128], index: 0, kind: input, shape index: {}]   ;;  %s530_s1 = inlined_call_operand.hbm [shape: f32[128,256], index: 1, kind: input, shape index: {}]   ;;  %s531_s2 = inlined_call_operand.hbm [shape: f32[1,256], index: 2, kind: input, shape index: {}]   ;;  %s532_s3 = inlined_call_operand.hbm [shape: f32[256,128], index: 3, kind: input, shape index: {}]   ;;  %s533_s4 = inlined_call_operand.vmem [shape: f32[1,128], index: 4, kind: input, shape index: {}]   ;;  %s534_s5 = inlined_call_operand.hbm [shape: f32[16,128], index: 5, kind: output, shape index: {}]  }
   0x1   :  { %11 = vsyncpa [#allocation6], 0 }
   0x2   :  { %12 = vsyncpa [#allocation9], 0  ;;  %s31_s20 = sshll.u32 %s530_s1, 4  ;;  %s32_s20 = int_to_ptr.hbm [resolvable:$true] %s31_s20 }
   0x3   :  { %13 = vsyncpa [#allocation4], 0  ;;  %s463_s21 = smov [#allocation5]   ;;  %s18_s25 = sshll.u32 %s529_s0, 4  ;;  %s19_s25 = int_to_ptr.hbm [resolvable:$true] %s18_s25 }
   0x4   :  { %s33_s22 = sshll.u32 %s463_s21, 4  ;;  %s464_s26 = smov 256   ;;  %s34_s22 = int_to_ptr.vmem [resolvable:$true] %s33_s22 }
   0x5   :  { %s465_s27 = smov 16   ;;  %s466_s28 = smov [#allocation2]  }
   0x6   :  { %39 = dma.hbm_to_vmem [thread:$0]  %s32_s20, 4096, %s34_s22, [#allocation6], %s464_s26, %s464_s26, %s465_s27  }
   0x7   :  { %s20_s29 = sshll.u32 %s466_s28, 4  ;;  %s467_s30 = smov 128   ;;  %s21_s29 = int_to_ptr.vmem [resolvable:$true] %s20_s29 }
   0x8   :  { %s468_s6 = smov 8   ;;  %s45_s8 = sshll.u32 %s531_s2, 4  ;;  %s46_s8 = int_to_ptr.hbm [resolvable:$true] %s45_s8 }
   0x9   :  { %26 = dma.hbm_to_vmem [thread:$0]  %s19_s25, 256, %s21_s29, [#allocation3], %s467_s30, %s467_s30, %s468_s6  }
   0xa   :  { %s469_s9 = smov [#allocation7]   ;;  %s55_s12 = sshll.u32 %s532_s3, 4  ;;  %s56_s12 = int_to_ptr.hbm [resolvable:$true] %s55_s12 }
   0xb   :  { %s47_s0 = sshll.u32 %s469_s9, 4  ;;  %s470_s13 = smov [#allocation8]   ;;  %s48_s0 = int_to_ptr.vmem [resolvable:$true] %s47_s0 }
   0xc   :  { %50 = dma.hbm_to_vmem [thread:$0]  %s46_s8, 32, %s48_s0, [#allocation6]  }
   0xd   :  { %s57_s14 = sshll.u32 %s470_s13, 4  ;;  %s58_s14 = int_to_ptr.vmem [resolvable:$true] %s57_s14 }
   0xe   :  { %63 = dma.hbm_to_vmem [thread:$0]  %s56_s12, 4096, %s58_s14, [#allocation9], %s467_s30, %s467_s30, %s468_s6  }
   0xf   :  { %455 = dma.done.wait [#allocation3], 256  }
  0x10   :  { %456 = vsyncadd [#allocation3], 4294967040 }
  0x11   :  { %457 = dma.done.wait [#allocation6], 4128  }
  0x12   :  { %458 = vsyncadd [#allocation6], 4294963168 }
  0x13   :  { %459 = dma.done.wait [#allocation9], 4096  }
  0x14   :  { %460 = vsyncadd [#allocation9], 4294963200  ;;  %v114_v0 = vld [vmem:[#allocation5 + $0xf0] sm:$0xff]  ;;  %v112_v1 = vld [vmem:[#allocation5 + $0xe0] sm:$0xff]  ;;  %s300_s18 = sshll.u32 %s534_s5, 4  ;;  %s301_s18 = int_to_ptr.hbm [resolvable:$true] %s300_s18 }
  0x15   :  { %v115_v2 = vld [vmem:[#allocation5 + $0xf8] sm:$0xff]  ;;  %122 = vmatpush.msra.mxu0 %v114_v0  ;;  %v113_v3 = vld [vmem:[#allocation5 + $0xe8] sm:$0xff]  ;;  %v110_v4 = vld [vmem:[#allocation5 + $0xd0] sm:$0xff] }
  0x16   :  { %145 = vmatpush.msra.mxu1 %v115_v2  ;;  %v111_v5 = vld [vmem:[#allocation5 + $0xd8] sm:$0xff]  ;;  %v108_v6 = vld [vmem:[#allocation5 + $0xc0] sm:$0xff]  ;;  %v109_v7 = vld [vmem:[#allocation5 + $0xc8] sm:$0xff] }
  0x17   :  { %123 = vmatpush.msra.mxu0 %v112_v1  ;;  %v106_v8 = vld [vmem:[#allocation5 + $0xb0] sm:$0xff]  ;;  %v107_v9 = vld [vmem:[#allocation5 + $0xb8] sm:$0xff]  ;;  %v104_v10 = vld [vmem:[#allocation5 + $0xa0] sm:$0xff] }
  0x18   :  { %146 = vmatpush.msra.mxu1 %v113_v3  ;;  %v105_v11 = vld [vmem:[#allocation5 + $0xa8] sm:$0xff]  ;;  %v102_v12 = vld [vmem:[#allocation5 + $0x90] sm:$0xff]  ;;  %v103_v13 = vld [vmem:[#allocation5 + $0x98] sm:$0xff] }
  0x19   :  { %124 = vmatpush.msra.mxu0 %v110_v4  ;;  %v187_v14 = vld [vmem:[#allocation8 + $0x78] sm:$0xff]  ;;  %v186_v15 = vld [vmem:[#allocation8 + $0x70] sm:$0xff]  ;;  %v101_v17 = vld [vmem:[#allocation5 + $0x88] sm:$0xff] }
  0x1a   :  { %147 = vmatpush.msra.mxu1 %v111_v5  ;;  %v100_v16 = vld [vmem:[#allocation5 + $0x80] sm:$0xff]  ;;  %208 = vmatpush.msra.mxu2 %v187_v14  ;;  %v185_v19 = vld [vmem:[#allocation8 + $0x68] sm:$0xff]  ;;  %v202_v20 = vld [vmem:[#allocation8 + $0xf0] sm:$0xff] }
  0x1b   :  { %125 = vmatpush.msra.mxu0 %v108_v6  ;;  %v203_v18 = vld [vmem:[#allocation8 + $0xf8] sm:$0xff]  ;;  %v98_v21 = vld [vmem:[#allocation5 + $0x70] sm:$0xff]  ;;  %v184_v23 = vld [vmem:[#allocation8 + $0x60] sm:$0xff] }
  0x1c   :  { %148 = vmatpush.msra.mxu1 %v109_v7  ;;  %v99_v22 = vld [vmem:[#allocation5 + $0x78] sm:$0xff]  ;;  %209 = vmatpush.msra.mxu2 %v186_v15  ;;  %v201_v24 = vld [vmem:[#allocation8 + $0xe8] sm:$0xff]  ;;  %v96_v25 = vld [vmem:[#allocation5 + $0x60] sm:$0xff] }
  0x1d   :  { %126 = vmatpush.msra.mxu0 %v106_v8  ;;  %231 = vmatpush.msra.mxu3 %v203_v18  ;;  %v97_v26 = vld [vmem:[#allocation5 + $0x68] sm:$0xff]  ;;  %v183_v27 = vld [vmem:[#allocation8 + $0x58] sm:$0xff]  ;;  %v94_v29 = vld [vmem:[#allocation5 + $0x50] sm:$0xff] }
  0x1e   :  { %149 = vmatpush.msra.mxu1 %v107_v9  ;;  %210 = vmatpush.msra.mxu2 %v185_v19  ;;  %v200_v28 = vld [vmem:[#allocation8 + $0xe0] sm:$0xff]  ;;  %v95_v30 = vld [vmem:[#allocation5 + $0x58] sm:$0xff]  ;;  %v181_v35 = vld [vmem:[#allocation8 + $0x48] sm:$0xff] }
  0x1f   :  { %127 = vmatpush.msra.mxu0 %v104_v10  ;;  %232 = vmatpush.msra.mxu3 %v202_v20  ;;  %v182_v31 = vld [vmem:[#allocation8 + $0x50] sm:$0xff]  ;;  %v199_v32 = vld [vmem:[#allocation8 + $0xd8] sm:$0xff]  ;;  %v93_v34 = vld [vmem:[#allocation5 + $0x48] sm:$0xff] }
  0x20   :  { %150 = vmatpush.msra.mxu1 %v105_v11  ;;  %211 = vmatpush.msra.mxu2 %v184_v23  ;;  %v92_v33 = vld [vmem:[#allocation5 + $0x40] sm:$0xff]  ;;  %v198_v36 = vld [vmem:[#allocation8 + $0xd0] sm:$0xff]  ;;  %v197_v40 = vld [vmem:[#allocation8 + $0xc8] sm:$0xff] }
  0x21   :  { %128 = vmatpush.msra.mxu0 %v102_v12  ;;  %233 = vmatpush.msra.mxu3 %v201_v24  ;;  %v90_v37 = vld [vmem:[#allocation5 + $0x30] sm:$0xff]  ;;  %v91_v38 = vld [vmem:[#allocation5 + $0x38] sm:$0xff]  ;;  %v180_v39 = vld [vmem:[#allocation8 + $0x40] sm:$0xff] }
  0x22   :  { %151 = vmatpush.msra.mxu1 %v103_v13  ;;  %212 = vmatpush.msra.mxu2 %v183_v27  ;;  %v88_v41 = vld [vmem:[#allocation5 + $0x20] sm:$0xff]  ;;  %v89_v42 = vld [vmem:[#allocation5 + $0x28] sm:$0xff]  ;;  %v86_v45 = vld [vmem:[#allocation5 + $0x10] sm:$0xff] }
  0x23   :  { %129 = vmatpush.msra.mxu0 %v100_v16  ;;  %234 = vmatpush.msra.mxu3 %v200_v28  ;;  %v179_v43 = vld [vmem:[#allocation8 + $0x38] sm:$0xff]  ;;  %v196_v44 = vld [vmem:[#allocation8 + $0xc0] sm:$0xff]  ;;  %v178_v47 = vld [vmem:[#allocation8 + $0x30] sm:$0xff] }
  0x24   :  { %152 = vmatpush.msra.mxu1 %v101_v17  ;;  %213 = vmatpush.msra.mxu2 %v182_v31  ;;  %v87_v46 = vld [vmem:[#allocation5 + $0x18] sm:$0xff]  ;;  %v84_v49 = vld [vmem:[#allocation5] sm:$0xff]  ;;  %v85_v50 = vld [vmem:[#allocation5 + $0x8] sm:$0xff] }
  0x25   :  { %130 = vmatpush.msra.mxu0 %v98_v21  ;;  %235 = vmatpush.msra.mxu3 %v199_v32  ;;  %v195_v48 = vld [vmem:[#allocation8 + $0xb8] sm:$0xff]  ;;  %v82_v51 = vld [vmem:[#allocation2] sm:$0xff]  ;;  %v176_v54 = vld [vmem:[#allocation8 + $0x20] sm:$0xff] }
  0x26   :  { %153 = vmatpush.msra.mxu1 %v99_v22  ;;  %214 = vmatpush.msra.mxu2 %v181_v35  ;;  %v177_v52 = vld [vmem:[#allocation8 + $0x28] sm:$0xff]  ;;  %v194_v53 = vld [vmem:[#allocation8 + $0xb0] sm:$0xff]  ;;  %v175_v56 = vld [vmem:[#allocation8 + $0x18] sm:$0xff] }
  0x27   :  { %131 = vmatpush.msra.mxu0 %v96_v25  ;;  %236 = vmatpush.msra.mxu3 %v198_v36  ;;  %v193_v55 = vld [vmem:[#allocation8 + $0xa8] sm:$0xff]  ;;  %v192_v57 = vld [vmem:[#allocation8 + $0xa0] sm:$0xff]  ;;  %v83_v58 = vld [vmem:[#allocation2 + $0x8] sm:$0xff] }
  0x28   :  { %154 = vmatpush.msra.mxu1 %v97_v26  ;;  %215 = vmatpush.msra.mxu2 %v180_v39  ;;  %v174_v59 = vld [vmem:[#allocation8 + $0x10] sm:$0xff]  ;;  %v191_v60 = vld [vmem:[#allocation8 + $0x98] sm:$0xff]  ;;  %v173_v61 = vld [vmem:[#allocation8 + $0x8] sm:$0xff] }
  0x29   :  { %132 = vmatpush.msra.mxu0 %v94_v29  ;;  %237 = vmatpush.msra.mxu3 %v197_v40  ;;  %v190_v62 = vld [vmem:[#allocation8 + $0x90] sm:$0xff]  ;;  %v172_v63 = vld [vmem:[#allocation8] sm:$0xff]  ;;  %v189_v0 = vld [vmem:[#allocation8 + $0x88] sm:$0xff] }
  0x2a   :  { %155 = vmatpush.msra.mxu1 %v95_v30  ;;  %216 = vmatpush.msra.mxu2 %v179_v43  ;;  %v188_v1 = vld [vmem:[#allocation8 + $0x80] sm:$0xff]  ;;  %v116_v2 = vld [vmem:[#allocation7] sm:$0x3]  ;;  %v326_v17 = vld [vmem:[%s533_s4] ss:$0 sm:$0xff]  ;;  %s471_s4 = smov [#allocation10]  }
  0x2b   :  { %133 = vmatpush.msra.mxu0 %v92_v33  ;;  %238 = vmatpush.msra.mxu3 %v196_v44  ;;  %v118_v3 = vperm.slane %v116_v2, 0  ;;  %v119_v4 = vperm.slane %v116_v2, 1  ;;  %s298_s15 = sshll.u32 %s471_s4, 4  ;;  %s299_s15 = int_to_ptr.vmem [resolvable:$true] %s298_s15 }
  0x2c   :  { %156 = vmatpush.msra.mxu1 %v93_v34  ;;  %217 = vmatpush.msra.mxu2 %v178_v47 }
  0x2d   :  { %134 = vmatpush.msra.mxu0 %v90_v37  ;;  %239 = vmatpush.msra.mxu3 %v195_v48 }
  0x2e   :  { %157 = vmatpush.msra.mxu1 %v91_v38  ;;  %218 = vmatpush.msra.mxu2 %v177_v52 }
  0x2f   :  { %135 = vmatpush.msra.mxu0 %v88_v41  ;;  %240 = vmatpush.msra.mxu3 %v194_v53 }
  0x30   :  { %158 = vmatpush.msra.mxu1 %v89_v42  ;;  %219 = vmatpush.msra.mxu2 %v176_v54 }
  0x31   :  { %136 = vmatpush.msra.mxu0 %v86_v45  ;;  %241 = vmatpush.msra.mxu3 %v193_v55 }
  0x32   :  { %159 = vmatpush.msra.mxu1 %v87_v46  ;;  %220 = vmatpush.msra.mxu2 %v175_v56 }
  0x33   :  { %137 = vmatpush.msra.mxu0 %v84_v49  ;;  %242 = vmatpush.msra.mxu3 %v192_v57 }
  0x34   :  { %160 = vmatpush.msra.mxu1 %v85_v50  ;;  %138 = vmatmul.f32.vlgmr.msra.gmra.mxu0 %v82_v51 }
  0x35   :  { %161 = vmatmul.f32.vlgmr.msra.gmra.mxu1 %v82_v51  ;;  %221 = vmatpush.msra.mxu2 %v174_v59 }
  0x36   :  { %243 = vmatpush.msra.mxu3 %v191_v60 }
  0x37   :  { %222 = vmatpush.msra.mxu2 %v173_v61 }
  0x38   :  { %244 = vmatpush.msra.mxu3 %v190_v62 }
  0x39   :  { %223 = vmatpush.msra.mxu2 %v172_v63 }
  0x3a   :  { %245 = vmatpush.msra.mxu3 %v189_v0 }
  0x3c   :  { %141 = vmatmul.f32.gmra.mxu0 %v83_v58  ;;  %246 = vmatpush.msra.mxu3 %v188_v1 }
  0x3d   :  { %164 = vmatmul.f32.gmra.mxu1 %v83_v58 }
  0xb1   :  { %v139_v5 = vpop.f32.mrf.mxu0 }
  0xb2   :  { %v162_v6 = vpop.f32.mrf.mxu1  ;;  %v140_v7 = vadd.f32 %v139_v5, %v118_v3 }
  0xb3   :  { %v163_v8 = vadd.f32 %v162_v6, %v119_v4 }
  0xb4   :  { %v168_v9 = vmax.f32 %v140_v7, 0.0 }
  0xb5   :  { %v169_v10 = vmax.f32 %v163_v8, 0.0 }
  0xb6   :  { %224 = vmatmul.f32.vlgmr.msra.gmra.mxu2 %v168_v9 }
  0xb7   :  { %247 = vmatmul.f32.vlgmr.msra.gmra.mxu3 %v169_v10 }
  0xb9   :  { %v142_v11 = vpop.f32.mrf.mxu0 }
  0xba   :  { %v165_v12 = vpop.f32.mrf.mxu1  ;;  %v143_v13 = vadd.f32 %v142_v11, %v118_v3 }
  0xbb   :  { %v166_v14 = vadd.f32 %v165_v12, %v119_v4 }
  0xbc   :  { %v170_v15 = vmax.f32 %v143_v13, 0.0 }
  0xbd   :  { %v171_v16 = vmax.f32 %v166_v14, 0.0 }
  0xbe   :  { %227 = vmatmul.f32.gmra.mxu2 %v170_v15 }
  0xbf   :  { %250 = vmatmul.f32.gmra.mxu3 %v171_v16 }
 0x139   :  { %v225_v18 = vpop.f32.mrf.mxu2 }
 0x13a   :  { %v248_v19 = vpop.f32.mrf.mxu3  ;;  %v226_v20 = vadd.f32 %v326_v17, %v225_v18 }
 0x13c   :  { %v249_v21 = vadd.f32 %v248_v19, %v226_v20 }
 0x13e   :  { %v315_v22 = vmul.f32 -1.442695, %v249_v21 }
 0x140   :  { %327 = vpow2.f32 %v315_v22 }
 0x141   :  { %v228_v23 = vpop.f32.mrf.mxu2 }
 0x142   :  { %v251_v24 = vpop.f32.mrf.mxu3  ;;  %v229_v25 = vadd.f32 %v326_v17, %v228_v23 }
 0x144   :  { %v252_v26 = vadd.f32 %v251_v24, %v229_v25 }
 0x146   :  { %v328_v27 = vpop.eup %327  ;;  %v316_v28 = vmul.f32 -1.442695, %v252_v26 }
 0x147   :  { %v260_v29 = vadd.f32 1.0, %v328_v27 }
 0x148   :  { %329 = vpow2.f32 %v316_v28 }
 0x149   :  { %331 = vrcp.f32 %v260_v29  ;;  %v273_v35 = vand.u32 2147483648, %v260_v29  ;;  %v271_v37 = vand.u32 2147483647, %v260_v29  ;;  %vm267_vm1 = vweird.f32 %v260_v29 }
 0x14b   :  { %v274_v40 = vor.u32 1.1754944e-38, %v273_v35  ;;  %vm272_vm3 = vcmp.eq.f32.partialorder %v271_v37, 8.507059e+37 }
 0x14e   :  { %v330_v30 = vpop.eup %329 }
 0x14f   :  { %v332_v31 = vpop.eup %331  ;;  %v261_v32 = vadd.f32 1.0, %v330_v30 }
 0x150   :  { %v263_v33 = vmul.f32 %v332_v31, %v260_v29  ;;  %vm268_vm0 = vweird.f32 %v332_v31 }
 0x151   :  { %333 = vrcp.f32 %v261_v32  ;;  %vm269_vm2 = vmor %vm267_vm1, %vm268_vm0  ;;  %v288_v45 = vand.u32 2147483648, %v261_v32  ;;  %v286_v47 = vand.u32 2147483647, %v261_v32  ;;  %vm282_vm5 = vweird.f32 %v261_v32 }
 0x152   :  { %v264_v34 = vsub.f32 1.0, %v263_v33 }
 0x153   :  { %v289_v49 = vor.u32 1.1754944e-38, %v288_v45  ;;  %vm287_vm7 = vcmp.eq.f32.partialorder %v286_v47, 8.507059e+37 }
 0x154   :  { %v265_v36 = vmul.f32 %v332_v31, %v264_v34 }
 0x156   :  { %v266_v38 = vadd.f32 %v332_v31, %v265_v36 }
 0x157   :  { %v334_v39 = vpop.eup %333 }
 0x158   :  { %v278_v41 = vmul.f32 %v334_v39, %v261_v32  ;;  %v270_v42 = vsel %vm269_vm2, %v332_v31, %v266_v38  ;;  %vm283_vm4 = vweird.f32 %v334_v39 }
 0x159   :  { %v275_v43 = vsel %vm272_vm3, %v274_v40, %v270_v42  ;;  %vm284_vm6 = vmor %vm282_vm5, %vm283_vm4 }
 0x15a   :  { %v279_v44 = vsub.f32 1.0, %v278_v41  ;;  %292 = vst [vmem:[#allocation10] sm:$0xff] %v275_v43 }
 0x15c   :  { %v280_v46 = vmul.f32 %v334_v39, %v279_v44 }
 0x15e   :  { %v281_v48 = vadd.f32 %v334_v39, %v280_v46 }
 0x160   :  { %v285_v50 = vsel %vm284_vm6, %v334_v39, %v281_v48 }
 0x161   :  { %v290_v51 = vsel %vm287_vm7, %v289_v49, %v285_v50 }
 0x162   :  { %293 = vst [vmem:[#allocation10 + $0x8] sm:$0xff] %v290_v51 }
 0x163   :  { %306 = dma.vmem_to_hbm [thread:$0]  %s299_s15, 256, %s301_s18, [#allocation4], %s467_s30, %s467_s30, %s468_s6  }
 0x164   :  { %461 = dma.done.wait [#allocation4], 256  }
 0x165   :  { %462 = vsyncadd [#allocation4], 4294967040 }
 0x166   :  { %311 = vsyncpa [#allocation3], 1 }
 0x167   :  { %312 = vsyncpa [#allocation6], 1 }
 0x168   :  { %313 = vsyncpa [#allocation9], 1 }
 0x169   :  { %314 = vsyncpa [#allocation4], 1 }

</bundles_post_ra>
